<compile_context>
chip_gen: v6e
topology: v6e:2x2x1
jax: 0.10.0
libtpu: 0.0.40
codegen_flags: <defaults>
</compile_context>

<pallas_src>
import jax
import jax.numpy as jnp
import numpy as np
from jax.experimental import pallas as pl
from jax.experimental.pallas import tpu as pltpu

# ---------------- model dims (small, consistent with the module) ----------------
VOCAB_SIZE = 50
EMBEDDING_DIM = 16
HIDDEN_DIM = 32
OUTPUT_DIM = 16
SEQ_LEN = 8    # T (dim0, time for nn.LSTM)
BATCH = 2      # B (dim1, batch for nn.LSTM; forward averages over it)

# gate re-packing: PyTorch order is (i, f, g, o); fused layout is (i, f, o, g)
_GATE_PERM = np.array([0, 1, 3, 2], dtype=np.int32)

# packed-weight buffer layout (rows, all sections sublane-aligned)
_V_PAD = 56                                   # vocab rows padded up to a multiple of 8
_ROW_WHH = _V_PAD                             # (H, 4H) recurrent weights
_ROW_WFC = _V_PAD + HIDDEN_DIM                # (H, 4H) fc weights (lanes [0:O] valid)
_ROW_BFC = _V_PAD + 2 * HIDDEN_DIM            # (1, 4H) fc bias    (lanes [0:O] valid)
_PACK_ROWS = _V_PAD + 2 * HIDDEN_DIM + 1      # 121


def pack_params(params):
    """One-time weight re-layout + embedding/input-projection folding (init time)."""
    emb, w_ih, w_hh, b_ih, b_hh, w_fc, b_fc = params
    E, H, O = EMBEDDING_DIM, HIDDEN_DIM, OUTPUT_DIM
    wih_fused = jnp.transpose(w_ih.reshape(4, H, E)[_GATE_PERM], (2, 0, 1)).reshape(E, 4 * H)
    whh_fused = jnp.transpose(w_hh.reshape(4, H, H)[_GATE_PERM], (2, 0, 1)).reshape(H, 4 * H)
    b_fused = (b_ih + b_hh).reshape(4, H)[_GATE_PERM].reshape(1, 4 * H)

    # embedding + input projection + bias folded into one per-token gate-input table
    xg_table = jnp.zeros((_V_PAD, 4 * H), jnp.float32)
    xg_table = xg_table.at[:VOCAB_SIZE].set(emb @ wih_fused + b_fused)        # (V_PAD, 4H)

    wfc_pad = jnp.zeros((H, 4 * H), jnp.float32).at[:, :O].set(w_fc.T)        # (H, 4H)
    bfc_pad = jnp.zeros((1, 4 * H), jnp.float32).at[:, :O].set(b_fc[None, :]) # (1, 4H)

    packed = jnp.concatenate([xg_table, whh_fused, wfc_pad, bfc_pad], axis=0)
    return packed.astype(jnp.float32)                                         # (121, 128)


def _make_kernel(T, B):
    H, O = HIDDEN_DIM, OUTPUT_DIM

    def kernel(ids_ref, w_ref, out_ref):
        whh = w_ref[pl.ds(_ROW_WHH, H), :]                     # loop-invariant (H, 4H)

        h = None
        c = None
        h_means = []
        for t in range(T):                                     # static unroll, T = 8
            # per-step embedding + input-projection: gather B rows of the
            # pre-multiplied table using token ids read from SMEM
            rows = [w_ref[pl.ds(ids_ref[t * B + b], 1), :] for b in range(B)]
            xg_t = jnp.concatenate(rows, axis=0)               # (B, 4H) in vregs

            if t == 0:
                g = xg_t                                       # h0 == 0: peel the matmul
            else:
                # fused recurrent matmul: (B, H) @ (H, 4H = 128)
                g = xg_t + jnp.dot(h, whh, preferred_element_type=jnp.float32)

            # two EUP pushes per step: sigmoid over contiguous (i, f, o), tanh over g
            sig = jax.nn.sigmoid(g[:, 0:3 * H])
            i_g = sig[:, 0:H]
            f_g = sig[:, H:2 * H]
            o_g = sig[:, 2 * H:3 * H]
            g_g = jnp.tanh(g[:, 3 * H:4 * H])

            c = i_g * g_g if t == 0 else f_g * c + i_g * g_g   # c0 == 0: drop f*c at t=0
            h = o_g * jnp.tanh(c)                              # (B, H)
            # batch mean folded into the loop; stays in vregs (no VMEM stores)
            h_means.append(jnp.mean(h, axis=0, keepdims=True))  # (1, H)

        h_mean = jnp.concatenate(h_means, axis=0)              # (T, H)
        wfc = w_ref[pl.ds(_ROW_WFC, H), pl.ds(0, O)]           # (H, O)
        bfc = w_ref[pl.ds(_ROW_BFC, 1), pl.ds(0, O)]           # (1, O)
        # fc is affine => commutes with the batch mean: one tail matmul + one store
        out_ref[...] = jnp.dot(h_mean, wfc, preferred_element_type=jnp.float32) + bfc

    return kernel


@jax.jit
def lstm_embedding_forward(input_sequence, packed_weights):
    """input_sequence: (T, B) int32 token ids.  Returns (T, OUTPUT_DIM) float32."""
    T, B = input_sequence.shape
    ids = input_sequence.reshape(-1).astype(jnp.int32)         # (T*B,), row-major = t*B + b
    return pl.pallas_call(
        _make_kernel(T, B),
        out_shape=jax.ShapeDtypeStruct((T, OUTPUT_DIM), jnp.float32),
        in_specs=[
            pl.BlockSpec(memory_space=pltpu.MemorySpace.SMEM),   # token ids (scalars)
            pl.BlockSpec(memory_space=pltpu.MemorySpace.VMEM),   # single packed weight buffer
        ],
        out_specs=pl.BlockSpec(memory_space=pltpu.MemorySpace.VMEM),
    )(ids, packed_weights)


def reference_forward(input_sequence, params):
    """Pure-JAX reference matching torch semantics exactly."""
    emb, w_ih, w_hh, b_ih, b_hh, w_fc, b_fc = params
    H = HIDDEN_DIM
    x = jnp.take(emb, input_sequence, axis=0)                 # (T, B, E)
    T, B, _ = x.shape
    h = jnp.zeros((B, H), jnp.float32)
    c = jnp.zeros((B, H), jnp.float32)
    outs = []
    for t in range(T):
        gates = x[t] @ w_ih.T + b_ih + h @ w_hh.T + b_hh      # (B, 4H)
        i_g = jax.nn.sigmoid(gates[:, 0:H])
        f_g = jax.nn.sigmoid(gates[:, H:2 * H])
        g_g = jnp.tanh(gates[:, 2 * H:3 * H])
        o_g = jax.nn.sigmoid(gates[:, 3 * H:4 * H])
        c = f_g * c + i_g * g_g
        h = o_g * jnp.tanh(c)
        outs.append(h)
    out = jnp.stack(outs, axis=0)                             # (T, B, H)
    y = out @ w_fc.T + b_fc                                   # (T, B, O)
    return jnp.mean(y, axis=1)                                # (T, O)


def init_params(key):
    ks = jax.random.split(key, 7)
    s = 1.0 / np.sqrt(HIDDEN_DIM)
    emb = jax.random.normal(ks[0], (VOCAB_SIZE, EMBEDDING_DIM), jnp.float32)
    w_ih = jax.random.uniform(ks[1], (4 * HIDDEN_DIM, EMBEDDING_DIM), jnp.float32, -s, s)
    w_hh = jax.random.uniform(ks[2], (4 * HIDDEN_DIM, HIDDEN_DIM), jnp.float32, -s, s)
    b_ih = jax.random.uniform(ks[3], (4 * HIDDEN_DIM,), jnp.float32, -s, s)
    b_hh = jax.random.uniform(ks[4], (4 * HIDDEN_DIM,), jnp.float32, -s, s)
    w_fc = jax.random.uniform(ks[5], (OUTPUT_DIM, HIDDEN_DIM), jnp.float32, -s, s)
    b_fc = jax.random.uniform(ks[6], (OUTPUT_DIM,), jnp.float32, -s, s)
    return emb, w_ih, w_hh, b_ih, b_hh, w_fc, b_fc


if __name__ == "__main__":
    key = jax.random.PRNGKey(0)
    pkey, ikey = jax.random.split(key)
    params = init_params(pkey)

    # one-time init-side re-layout (NOT on the per-call forward path)
    packed = jax.block_until_ready(pack_params(params))

    input_sequence = jax.random.randint(ikey, (SEQ_LEN, BATCH), 0, VOCAB_SIZE, jnp.int32)

    out = jax.block_until_ready(lstm_embedding_forward(input_sequence, packed))

    ref = jax.block_until_ready(reference_forward(input_sequence, params))
    np.testing.assert_allclose(np.asarray(out), np.asarray(ref), rtol=1e-4, atol=1e-4)

    assert out.shape == (SEQ_LEN, OUTPUT_DIM) and out.dtype == jnp.float32
    print("KERNEL_OK")
</pallas_src>

<mosaic_0001>
module attributes {stable_mosaic.version = 11 : i64} {
  func.func @kernel(%arg0: memref<16xi32, #tpu.memory_space<smem>>, %arg1: memref<121x128xf32, #tpu.memory_space<vmem>>, %arg2: memref<8x16xf32, #tpu.memory_space<vmem>>) attributes {dimension_semantics = [], scalar_prefetch = 0 : i64, scratch_operands = 0 : i64, tpu.core_type = #tpu.core_type<tc>} {
    %c56 = arith.constant 56 : index
    %c0 = arith.constant 0 : index
    %0 = vector.load %arg1[%c56, %c0] : memref<121x128xf32, #tpu.memory_space<vmem>>, vector<32x128xf32>
    %c0_0 = arith.constant 0 : index
    %1 = memref.load %arg0[%c0_0] : memref<16xi32, #tpu.memory_space<smem>>
    %2 = arith.index_cast %1 : i32 to index
    %c0_1 = arith.constant 0 : index
    %3 = vector.load %arg1[%2, %c0_1] : memref<121x128xf32, #tpu.memory_space<vmem>>, vector<1x128xf32>
    %c1 = arith.constant 1 : index
    %4 = memref.load %arg0[%c1] : memref<16xi32, #tpu.memory_space<smem>>
    %5 = arith.index_cast %4 : i32 to index
    %c0_2 = arith.constant 0 : index
    %6 = vector.load %arg1[%5, %c0_2] : memref<121x128xf32, #tpu.memory_space<vmem>>, vector<1x128xf32>
    %7 = tpu.concatenate %3, %6 in 0 : vector<1x128xf32>, vector<1x128xf32> -> vector<2x128xf32>
    %8 = vector.extract_strided_slice %7 {offsets = [0, 0], sizes = [2, 96], strides = [1, 1]} : vector<2x128xf32> to vector<2x96xf32>
    %9 = arith.negf %8 : vector<2x96xf32>
    %10 = math.exp %9 : vector<2x96xf32>
    %cst = arith.constant 1.000000e+00 : f32
    %11 = vector.broadcast %cst : f32 to vector<2x96xf32>
    %12 = arith.addf %11, %10 : vector<2x96xf32>
    %13 = arith.divf %11, %12 : vector<2x96xf32>
    %14 = vector.extract_strided_slice %13 {offsets = [0, 0], sizes = [2, 32], strides = [1, 1]} : vector<2x96xf32> to vector<2x32xf32>
    %15 = vector.extract_strided_slice %13 {offsets = [0, 64], sizes = [2, 32], strides = [1, 1]} : vector<2x96xf32> to vector<2x32xf32>
    %16 = vector.extract_strided_slice %7 {offsets = [0, 96], sizes = [2, 32], strides = [1, 1]} : vector<2x128xf32> to vector<2x32xf32>
    %17 = math.tanh %16 : vector<2x32xf32>
    %18 = arith.mulf %14, %17 : vector<2x32xf32>
    %19 = math.tanh %18 : vector<2x32xf32>
    %20 = arith.mulf %15, %19 : vector<2x32xf32>
    %cst_3 = arith.constant dense<0.000000e+00> : vector<32xf32>
    %21 = vector.multi_reduction <add>, %20, %cst_3 [0] : vector<2x32xf32> to vector<32xf32>
    %22 = vector.shape_cast %21 : vector<32xf32> to vector<1x32xf32>
    %cst_4 = arith.constant 2.000000e+00 : f32
    %23 = vector.broadcast %cst_4 : f32 to vector<1x32xf32>
    %24 = arith.divf %22, %23 : vector<1x32xf32>
    %c2 = arith.constant 2 : index
    %25 = memref.load %arg0[%c2] : memref<16xi32, #tpu.memory_space<smem>>
    %26 = arith.index_cast %25 : i32 to index
    %c0_5 = arith.constant 0 : index
    %27 = vector.load %arg1[%26, %c0_5] : memref<121x128xf32, #tpu.memory_space<vmem>>, vector<1x128xf32>
    %c3 = arith.constant 3 : index
    %28 = memref.load %arg0[%c3] : memref<16xi32, #tpu.memory_space<smem>>
    %29 = arith.index_cast %28 : i32 to index
    %c0_6 = arith.constant 0 : index
    %30 = vector.load %arg1[%29, %c0_6] : memref<121x128xf32, #tpu.memory_space<vmem>>, vector<1x128xf32>
    %31 = tpu.concatenate %27, %30 in 0 : vector<1x128xf32>, vector<1x128xf32> -> vector<2x128xf32>
    %cst_7 = arith.constant dense<0.000000e+00> : vector<2x128xf32>
    %32 = tpu.matmul %20, %0, %cst_7 {dimension_numbers = #tpu.dot_dimension_numbers<[1], [0], [0], [1], [0, 0, 1, 1], [], []>} : vector<2x32xf32>, vector<32x128xf32>, vector<2x128xf32> -> vector<2x128xf32>
    %33 = arith.addf %31, %32 : vector<2x128xf32>
    %34 = vector.extract_strided_slice %33 {offsets = [0, 0], sizes = [2, 96], strides = [1, 1]} : vector<2x128xf32> to vector<2x96xf32>
    %35 = arith.negf %34 : vector<2x96xf32>
    %36 = math.exp %35 : vector<2x96xf32>
    %cst_8 = arith.constant 1.000000e+00 : f32
    %37 = vector.broadcast %cst_8 : f32 to vector<2x96xf32>
    %38 = arith.addf %37, %36 : vector<2x96xf32>
    %39 = arith.divf %37, %38 : vector<2x96xf32>
    %40 = vector.extract_strided_slice %39 {offsets = [0, 0], sizes = [2, 32], strides = [1, 1]} : vector<2x96xf32> to vector<2x32xf32>
    %41 = vector.extract_strided_slice %39 {offsets = [0, 32], sizes = [2, 32], strides = [1, 1]} : vector<2x96xf32> to vector<2x32xf32>
    %42 = vector.extract_strided_slice %39 {offsets = [0, 64], sizes = [2, 32], strides = [1, 1]} : vector<2x96xf32> to vector<2x32xf32>
    %43 = vector.extract_strided_slice %33 {offsets = [0, 96], sizes = [2, 32], strides = [1, 1]} : vector<2x128xf32> to vector<2x32xf32>
    %44 = math.tanh %43 : vector<2x32xf32>
    %45 = arith.mulf %41, %18 : vector<2x32xf32>
    %46 = arith.mulf %40, %44 : vector<2x32xf32>
    %47 = arith.addf %45, %46 : vector<2x32xf32>
    %48 = math.tanh %47 : vector<2x32xf32>
    %49 = arith.mulf %42, %48 : vector<2x32xf32>
    %cst_9 = arith.constant dense<0.000000e+00> : vector<32xf32>
    %50 = vector.multi_reduction <add>, %49, %cst_9 [0] : vector<2x32xf32> to vector<32xf32>
    %51 = vector.shape_cast %50 : vector<32xf32> to vector<1x32xf32>
    %cst_10 = arith.constant 2.000000e+00 : f32
    %52 = vector.broadcast %cst_10 : f32 to vector<1x32xf32>
    %53 = arith.divf %51, %52 : vector<1x32xf32>
    %c4 = arith.constant 4 : index
    %54 = memref.load %arg0[%c4] : memref<16xi32, #tpu.memory_space<smem>>
    %55 = arith.index_cast %54 : i32 to index
    %c0_11 = arith.constant 0 : index
    %56 = vector.load %arg1[%55, %c0_11] : memref<121x128xf32, #tpu.memory_space<vmem>>, vector<1x128xf32>
    %c5 = arith.constant 5 : index
    %57 = memref.load %arg0[%c5] : memref<16xi32, #tpu.memory_space<smem>>
    %58 = arith.index_cast %57 : i32 to index
    %c0_12 = arith.constant 0 : index
    %59 = vector.load %arg1[%58, %c0_12] : memref<121x128xf32, #tpu.memory_space<vmem>>, vector<1x128xf32>
    %60 = tpu.concatenate %56, %59 in 0 : vector<1x128xf32>, vector<1x128xf32> -> vector<2x128xf32>
    %cst_13 = arith.constant dense<0.000000e+00> : vector<2x128xf32>
    %61 = tpu.matmul %49, %0, %cst_13 {dimension_numbers = #tpu.dot_dimension_numbers<[1], [0], [0], [1], [0, 0, 1, 1], [], []>} : vector<2x32xf32>, vector<32x128xf32>, vector<2x128xf32> -> vector<2x128xf32>
    %62 = arith.addf %60, %61 : vector<2x128xf32>
    %63 = vector.extract_strided_slice %62 {offsets = [0, 0], sizes = [2, 96], strides = [1, 1]} : vector<2x128xf32> to vector<2x96xf32>
    %64 = arith.negf %63 : vector<2x96xf32>
    %65 = math.exp %64 : vector<2x96xf32>
    %cst_14 = arith.constant 1.000000e+00 : f32
    %66 = vector.broadcast %cst_14 : f32 to vector<2x96xf32>
    %67 = arith.addf %66, %65 : vector<2x96xf32>
    %68 = arith.divf %66, %67 : vector<2x96xf32>
    %69 = vector.extract_strided_slice %68 {offsets = [0, 0], sizes = [2, 32], strides = [1, 1]} : vector<2x96xf32> to vector<2x32xf32>
    %70 = vector.extract_strided_slice %68 {offsets = [0, 32], sizes = [2, 32], strides = [1, 1]} : vector<2x96xf32> to vector<2x32xf32>
    %71 = vector.extract_strided_slice %68 {offsets = [0, 64], sizes = [2, 32], strides = [1, 1]} : vector<2x96xf32> to vector<2x32xf32>
    %72 = vector.extract_strided_slice %62 {offsets = [0, 96], sizes = [2, 32], strides = [1, 1]} : vector<2x128xf32> to vector<2x32xf32>
    %73 = math.tanh %72 : vector<2x32xf32>
    %74 = arith.mulf %70, %47 : vector<2x32xf32>
    %75 = arith.mulf %69, %73 : vector<2x32xf32>
    %76 = arith.addf %74, %75 : vector<2x32xf32>
    %77 = math.tanh %76 : vector<2x32xf32>
    %78 = arith.mulf %71, %77 : vector<2x32xf32>
    %cst_15 = arith.constant dense<0.000000e+00> : vector<32xf32>
    %79 = vector.multi_reduction <add>, %78, %cst_15 [0] : vector<2x32xf32> to vector<32xf32>
    %80 = vector.shape_cast %79 : vector<32xf32> to vector<1x32xf32>
    %cst_16 = arith.constant 2.000000e+00 : f32
    %81 = vector.broadcast %cst_16 : f32 to vector<1x32xf32>
    %82 = arith.divf %80, %81 : vector<1x32xf32>
    %c6 = arith.constant 6 : index
    %83 = memref.load %arg0[%c6] : memref<16xi32, #tpu.memory_space<smem>>
    %84 = arith.index_cast %83 : i32 to index
    %c0_17 = arith.constant 0 : index
    %85 = vector.load %arg1[%84, %c0_17] : memref<121x128xf32, #tpu.memory_space<vmem>>, vector<1x128xf32>
    %c7 = arith.constant 7 : index
    %86 = memref.load %arg0[%c7] : memref<16xi32, #tpu.memory_space<smem>>
    %87 = arith.index_cast %86 : i32 to index
    %c0_18 = arith.constant 0 : index
    %88 = vector.load %arg1[%87, %c0_18] : memref<121x128xf32, #tpu.memory_space<vmem>>, vector<1x128xf32>
    %89 = tpu.concatenate %85, %88 in 0 : vector<1x128xf32>, vector<1x128xf32> -> vector<2x128xf32>
    %cst_19 = arith.constant dense<0.000000e+00> : vector<2x128xf32>
    %90 = tpu.matmul %78, %0, %cst_19 {dimension_numbers = #tpu.dot_dimension_numbers<[1], [0], [0], [1], [0, 0, 1, 1], [], []>} : vector<2x32xf32>, vector<32x128xf32>, vector<2x128xf32> -> vector<2x128xf32>
    %91 = arith.addf %89, %90 : vector<2x128xf32>
    %92 = vector.extract_strided_slice %91 {offsets = [0, 0], sizes = [2, 96], strides = [1, 1]} : vector<2x128xf32> to vector<2x96xf32>
    %93 = arith.negf %92 : vector<2x96xf32>
    %94 = math.exp %93 : vector<2x96xf32>
    %cst_20 = arith.constant 1.000000e+00 : f32
    %95 = vector.broadcast %cst_20 : f32 to vector<2x96xf32>
    %96 = arith.addf %95, %94 : vector<2x96xf32>
    %97 = arith.divf %95, %96 : vector<2x96xf32>
    %98 = vector.extract_strided_slice %97 {offsets = [0, 0], sizes = [2, 32], strides = [1, 1]} : vector<2x96xf32> to vector<2x32xf32>
    %99 = vector.extract_strided_slice %97 {offsets = [0, 32], sizes = [2, 32], strides = [1, 1]} : vector<2x96xf32> to vector<2x32xf32>
    %100 = vector.extract_strided_slice %97 {offsets = [0, 64], sizes = [2, 32], strides = [1, 1]} : vector<2x96xf32> to vector<2x32xf32>
    %101 = vector.extract_strided_slice %91 {offsets = [0, 96], sizes = [2, 32], strides = [1, 1]} : vector<2x128xf32> to vector<2x32xf32>
    %102 = math.tanh %101 : vector<2x32xf32>
    %103 = arith.mulf %99, %76 : vector<2x32xf32>
    %104 = arith.mulf %98, %102 : vector<2x32xf32>
    %105 = arith.addf %103, %104 : vector<2x32xf32>
    %106 = math.tanh %105 : vector<2x32xf32>
    %107 = arith.mulf %100, %106 : vector<2x32xf32>
    %cst_21 = arith.constant dense<0.000000e+00> : vector<32xf32>
    %108 = vector.multi_reduction <add>, %107, %cst_21 [0] : vector<2x32xf32> to vector<32xf32>
    %109 = vector.shape_cast %108 : vector<32xf32> to vector<1x32xf32>
    %cst_22 = arith.constant 2.000000e+00 : f32
    %110 = vector.broadcast %cst_22 : f32 to vector<1x32xf32>
    %111 = arith.divf %109, %110 : vector<1x32xf32>
    %c8 = arith.constant 8 : index
    %112 = memref.load %arg0[%c8] : memref<16xi32, #tpu.memory_space<smem>>
    %113 = arith.index_cast %112 : i32 to index
    %c0_23 = arith.constant 0 : index
    %114 = vector.load %arg1[%113, %c0_23] : memref<121x128xf32, #tpu.memory_space<vmem>>, vector<1x128xf32>
    %c9 = arith.constant 9 : index
    %115 = memref.load %arg0[%c9] : memref<16xi32, #tpu.memory_space<smem>>
    %116 = arith.index_cast %115 : i32 to index
    %c0_24 = arith.constant 0 : index
    %117 = vector.load %arg1[%116, %c0_24] : memref<121x128xf32, #tpu.memory_space<vmem>>, vector<1x128xf32>
    %118 = tpu.concatenate %114, %117 in 0 : vector<1x128xf32>, vector<1x128xf32> -> vector<2x128xf32>
    %cst_25 = arith.constant dense<0.000000e+00> : vector<2x128xf32>
    %119 = tpu.matmul %107, %0, %cst_25 {dimension_numbers = #tpu.dot_dimension_numbers<[1], [0], [0], [1], [0, 0, 1, 1], [], []>} : vector<2x32xf32>, vector<32x128xf32>, vector<2x128xf32> -> vector<2x128xf32>
    %120 = arith.addf %118, %119 : vector<2x128xf32>
    %121 = vector.extract_strided_slice %120 {offsets = [0, 0], sizes = [2, 96], strides = [1, 1]} : vector<2x128xf32> to vector<2x96xf32>
    %122 = arith.negf %121 : vector<2x96xf32>
    %123 = math.exp %122 : vector<2x96xf32>
    %cst_26 = arith.constant 1.000000e+00 : f32
    %124 = vector.broadcast %cst_26 : f32 to vector<2x96xf32>
    %125 = arith.addf %124, %123 : vector<2x96xf32>
    %126 = arith.divf %124, %125 : vector<2x96xf32>
    %127 = vector.extract_strided_slice %126 {offsets = [0, 0], sizes = [2, 32], strides = [1, 1]} : vector<2x96xf32> to vector<2x32xf32>
    %128 = vector.extract_strided_slice %126 {offsets = [0, 32], sizes = [2, 32], strides = [1, 1]} : vector<2x96xf32> to vector<2x32xf32>
    %129 = vector.extract_strided_slice %126 {offsets = [0, 64], sizes = [2, 32], strides = [1, 1]} : vector<2x96xf32> to vector<2x32xf32>
    %130 = vector.extract_strided_slice %120 {offsets = [0, 96], sizes = [2, 32], strides = [1, 1]} : vector<2x128xf32> to vector<2x32xf32>
    %131 = math.tanh %130 : vector<2x32xf32>
    %132 = arith.mulf %128, %105 : vector<2x32xf32>
    %133 = arith.mulf %127, %131 : vector<2x32xf32>
    %134 = arith.addf %132, %133 : vector<2x32xf32>
    %135 = math.tanh %134 : vector<2x32xf32>
    %136 = arith.mulf %129, %135 : vector<2x32xf32>
    %cst_27 = arith.constant dense<0.000000e+00> : vector<32xf32>
    %137 = vector.multi_reduction <add>, %136, %cst_27 [0] : vector<2x32xf32> to vector<32xf32>
    %138 = vector.shape_cast %137 : vector<32xf32> to vector<1x32xf32>
    %cst_28 = arith.constant 2.000000e+00 : f32
    %139 = vector.broadcast %cst_28 : f32 to vector<1x32xf32>
    %140 = arith.divf %138, %139 : vector<1x32xf32>
    %c10 = arith.constant 10 : index
    %141 = memref.load %arg0[%c10] : memref<16xi32, #tpu.memory_space<smem>>
    %142 = arith.index_cast %141 : i32 to index
    %c0_29 = arith.constant 0 : index
    %143 = vector.load %arg1[%142, %c0_29] : memref<121x128xf32, #tpu.memory_space<vmem>>, vector<1x128xf32>
    %c11 = arith.constant 11 : index
    %144 = memref.load %arg0[%c11] : memref<16xi32, #tpu.memory_space<smem>>
    %145 = arith.index_cast %144 : i32 to index
    %c0_30 = arith.constant 0 : index
    %146 = vector.load %arg1[%145, %c0_30] : memref<121x128xf32, #tpu.memory_space<vmem>>, vector<1x128xf32>
    %147 = tpu.concatenate %143, %146 in 0 : vector<1x128xf32>, vector<1x128xf32> -> vector<2x128xf32>
    %cst_31 = arith.constant dense<0.000000e+00> : vector<2x128xf32>
    %148 = tpu.matmul %136, %0, %cst_31 {dimension_numbers = #tpu.dot_dimension_numbers<[1], [0], [0], [1], [0, 0, 1, 1], [], []>} : vector<2x32xf32>, vector<32x128xf32>, vector<2x128xf32> -> vector<2x128xf32>
    %149 = arith.addf %147, %148 : vector<2x128xf32>
    %150 = vector.extract_strided_slice %149 {offsets = [0, 0], sizes = [2, 96], strides = [1, 1]} : vector<2x128xf32> to vector<2x96xf32>
    %151 = arith.negf %150 : vector<2x96xf32>
    %152 = math.exp %151 : vector<2x96xf32>
    %cst_32 = arith.constant 1.000000e+00 : f32
    %153 = vector.broadcast %cst_32 : f32 to vector<2x96xf32>
    %154 = arith.addf %153, %152 : vector<2x96xf32>
    %155 = arith.divf %153, %154 : vector<2x96xf32>
    %156 = vector.extract_strided_slice %155 {offsets = [0, 0], sizes = [2, 32], strides = [1, 1]} : vector<2x96xf32> to vector<2x32xf32>
    %157 = vector.extract_strided_slice %155 {offsets = [0, 32], sizes = [2, 32], strides = [1, 1]} : vector<2x96xf32> to vector<2x32xf32>
    %158 = vector.extract_strided_slice %155 {offsets = [0, 64], sizes = [2, 32], strides = [1, 1]} : vector<2x96xf32> to vector<2x32xf32>
    %159 = vector.extract_strided_slice %149 {offsets = [0, 96], sizes = [2, 32], strides = [1, 1]} : vector<2x128xf32> to vector<2x32xf32>
    %160 = math.tanh %159 : vector<2x32xf32>
    %161 = arith.mulf %157, %134 : vector<2x32xf32>
    %162 = arith.mulf %156, %160 : vector<2x32xf32>
    %163 = arith.addf %161, %162 : vector<2x32xf32>
    %164 = math.tanh %163 : vector<2x32xf32>
    %165 = arith.mulf %158, %164 : vector<2x32xf32>
    %cst_33 = arith.constant dense<0.000000e+00> : vector<32xf32>
    %166 = vector.multi_reduction <add>, %165, %cst_33 [0] : vector<2x32xf32> to vector<32xf32>
    %167 = vector.shape_cast %166 : vector<32xf32> to vector<1x32xf32>
    %cst_34 = arith.constant 2.000000e+00 : f32
    %168 = vector.broadcast %cst_34 : f32 to vector<1x32xf32>
    %169 = arith.divf %167, %168 : vector<1x32xf32>
    %c12 = arith.constant 12 : index
    %170 = memref.load %arg0[%c12] : memref<16xi32, #tpu.memory_space<smem>>
    %171 = arith.index_cast %170 : i32 to index
    %c0_35 = arith.constant 0 : index
    %172 = vector.load %arg1[%171, %c0_35] : memref<121x128xf32, #tpu.memory_space<vmem>>, vector<1x128xf32>
    %c13 = arith.constant 13 : index
    %173 = memref.load %arg0[%c13] : memref<16xi32, #tpu.memory_space<smem>>
    %174 = arith.index_cast %173 : i32 to index
    %c0_36 = arith.constant 0 : index
    %175 = vector.load %arg1[%174, %c0_36] : memref<121x128xf32, #tpu.memory_space<vmem>>, vector<1x128xf32>
    %176 = tpu.concatenate %172, %175 in 0 : vector<1x128xf32>, vector<1x128xf32> -> vector<2x128xf32>
    %cst_37 = arith.constant dense<0.000000e+00> : vector<2x128xf32>
    %177 = tpu.matmul %165, %0, %cst_37 {dimension_numbers = #tpu.dot_dimension_numbers<[1], [0], [0], [1], [0, 0, 1, 1], [], []>} : vector<2x32xf32>, vector<32x128xf32>, vector<2x128xf32> -> vector<2x128xf32>
    %178 = arith.addf %176, %177 : vector<2x128xf32>
    %179 = vector.extract_strided_slice %178 {offsets = [0, 0], sizes = [2, 96], strides = [1, 1]} : vector<2x128xf32> to vector<2x96xf32>
    %180 = arith.negf %179 : vector<2x96xf32>
    %181 = math.exp %180 : vector<2x96xf32>
    %cst_38 = arith.constant 1.000000e+00 : f32
    %182 = vector.broadcast %cst_38 : f32 to vector<2x96xf32>
    %183 = arith.addf %182, %181 : vector<2x96xf32>
    %184 = arith.divf %182, %183 : vector<2x96xf32>
    %185 = vector.extract_strided_slice %184 {offsets = [0, 0], sizes = [2, 32], strides = [1, 1]} : vector<2x96xf32> to vector<2x32xf32>
    %186 = vector.extract_strided_slice %184 {offsets = [0, 32], sizes = [2, 32], strides = [1, 1]} : vector<2x96xf32> to vector<2x32xf32>
    %187 = vector.extract_strided_slice %184 {offsets = [0, 64], sizes = [2, 32], strides = [1, 1]} : vector<2x96xf32> to vector<2x32xf32>
    %188 = vector.extract_strided_slice %178 {offsets = [0, 96], sizes = [2, 32], strides = [1, 1]} : vector<2x128xf32> to vector<2x32xf32>
    %189 = math.tanh %188 : vector<2x32xf32>
    %190 = arith.mulf %186, %163 : vector<2x32xf32>
    %191 = arith.mulf %185, %189 : vector<2x32xf32>
    %192 = arith.addf %190, %191 : vector<2x32xf32>
    %193 = math.tanh %192 : vector<2x32xf32>
    %194 = arith.mulf %187, %193 : vector<2x32xf32>
    %cst_39 = arith.constant dense<0.000000e+00> : vector<32xf32>
    %195 = vector.multi_reduction <add>, %194, %cst_39 [0] : vector<2x32xf32> to vector<32xf32>
    %196 = vector.shape_cast %195 : vector<32xf32> to vector<1x32xf32>
    %cst_40 = arith.constant 2.000000e+00 : f32
    %197 = vector.broadcast %cst_40 : f32 to vector<1x32xf32>
    %198 = arith.divf %196, %197 : vector<1x32xf32>
    %c14 = arith.constant 14 : index
    %199 = memref.load %arg0[%c14] : memref<16xi32, #tpu.memory_space<smem>>
    %200 = arith.index_cast %199 : i32 to index
    %c0_41 = arith.constant 0 : index
    %201 = vector.load %arg1[%200, %c0_41] : memref<121x128xf32, #tpu.memory_space<vmem>>, vector<1x128xf32>
    %c15 = arith.constant 15 : index
    %202 = memref.load %arg0[%c15] : memref<16xi32, #tpu.memory_space<smem>>
    %203 = arith.index_cast %202 : i32 to index
    %c0_42 = arith.constant 0 : index
    %204 = vector.load %arg1[%203, %c0_42] : memref<121x128xf32, #tpu.memory_space<vmem>>, vector<1x128xf32>
    %205 = tpu.concatenate %201, %204 in 0 : vector<1x128xf32>, vector<1x128xf32> -> vector<2x128xf32>
    %cst_43 = arith.constant dense<0.000000e+00> : vector<2x128xf32>
    %206 = tpu.matmul %194, %0, %cst_43 {dimension_numbers = #tpu.dot_dimension_numbers<[1], [0], [0], [1], [0, 0, 1, 1], [], []>} : vector<2x32xf32>, vector<32x128xf32>, vector<2x128xf32> -> vector<2x128xf32>
    %207 = arith.addf %205, %206 : vector<2x128xf32>
    %208 = vector.extract_strided_slice %207 {offsets = [0, 0], sizes = [2, 96], strides = [1, 1]} : vector<2x128xf32> to vector<2x96xf32>
    %209 = arith.negf %208 : vector<2x96xf32>
    %210 = math.exp %209 : vector<2x96xf32>
    %cst_44 = arith.constant 1.000000e+00 : f32
    %211 = vector.broadcast %cst_44 : f32 to vector<2x96xf32>
    %212 = arith.addf %211, %210 : vector<2x96xf32>
    %213 = arith.divf %211, %212 : vector<2x96xf32>
    %214 = vector.extract_strided_slice %213 {offsets = [0, 0], sizes = [2, 32], strides = [1, 1]} : vector<2x96xf32> to vector<2x32xf32>
    %215 = vector.extract_strided_slice %213 {offsets = [0, 32], sizes = [2, 32], strides = [1, 1]} : vector<2x96xf32> to vector<2x32xf32>
    %216 = vector.extract_strided_slice %213 {offsets = [0, 64], sizes = [2, 32], strides = [1, 1]} : vector<2x96xf32> to vector<2x32xf32>
    %217 = vector.extract_strided_slice %207 {offsets = [0, 96], sizes = [2, 32], strides = [1, 1]} : vector<2x128xf32> to vector<2x32xf32>
    %218 = math.tanh %217 : vector<2x32xf32>
    %219 = arith.mulf %215, %192 : vector<2x32xf32>
    %220 = arith.mulf %214, %218 : vector<2x32xf32>
    %221 = arith.addf %219, %220 : vector<2x32xf32>
    %222 = math.tanh %221 : vector<2x32xf32>
    %223 = arith.mulf %216, %222 : vector<2x32xf32>
    %cst_45 = arith.constant dense<0.000000e+00> : vector<32xf32>
    %224 = vector.multi_reduction <add>, %223, %cst_45 [0] : vector<2x32xf32> to vector<32xf32>
    %225 = vector.shape_cast %224 : vector<32xf32> to vector<1x32xf32>
    %cst_46 = arith.constant 2.000000e+00 : f32
    %226 = vector.broadcast %cst_46 : f32 to vector<1x32xf32>
    %227 = arith.divf %225, %226 : vector<1x32xf32>
    %228 = tpu.concatenate %24, %53, %82, %111, %140, %169, %198, %227 in 0 : vector<1x32xf32>, vector<1x32xf32>, vector<1x32xf32>, vector<1x32xf32>, vector<1x32xf32>, vector<1x32xf32>, vector<1x32xf32>, vector<1x32xf32> -> vector<8x32xf32>
    %c88 = arith.constant 88 : index
    %c0_47 = arith.constant 0 : index
    %229 = vector.load %arg1[%c88, %c0_47] : memref<121x128xf32, #tpu.memory_space<vmem>>, vector<32x16xf32>
    %c120 = arith.constant 120 : index
    %c0_48 = arith.constant 0 : index
    %230 = vector.load %arg1[%c120, %c0_48] : memref<121x128xf32, #tpu.memory_space<vmem>>, vector<1x16xf32>
    %cst_49 = arith.constant dense<0.000000e+00> : vector<8x16xf32>
    %231 = tpu.matmul %228, %229, %cst_49 {dimension_numbers = #tpu.dot_dimension_numbers<[1], [0], [0], [1], [0, 0, 1, 1], [], []>} : vector<8x32xf32>, vector<32x16xf32>, vector<8x16xf32> -> vector<8x16xf32>
    %232 = vector.broadcast %230 : vector<1x16xf32> to vector<8x16xf32>
    %233 = arith.addf %231, %232 : vector<8x16xf32>
    %c0_50 = arith.constant 0 : index
    %c0_51 = arith.constant 0 : index
    %234 = vector.load %arg2[%c0_50, %c0_51] : memref<8x16xf32, #tpu.memory_space<vmem>>, vector<8x16xf32>
    tpu.vector_store %arg2[%c0_50, %c0_51], %233 {strides = array<i32>} : memref<8x16xf32, #tpu.memory_space<vmem>>, vector<8x16xf32>,
    return
  }
}

</mosaic_0001>

<bundles_post_ra>
// kernel: lstm_embedding_forward.1
= control target key start
LH: loop header
LB: loop body
LE: loop exit
PB: predicated region body
PF: predicated region fallthrough
CT: control target
= control target key end

     0   :  { %7 = vsyncpa [#allocation5], 0  ;;  %s1509_s0 = inlined_call_operand.vmem [shape: s32[16], index: 0, kind: input, shape index: {}]   ;;  %s1510_s1 = inlined_call_operand.hbm [shape: f32[121,128], index: 1, kind: input, shape index: {}]   ;;  %s1511_s2 = inlined_call_operand.hbm [shape: f32[8,16], index: 2, kind: output, shape index: {}]  }
   0x1   :  { %8 = vsyncpa [#allocation3], 0 }
   0x2   :  { %9 = vsyncpa [#allocation4], 0  ;;  %s16_s11 = sshll.u32 %s1509_s0, 4  ;;  %s17_s11 = int_to_ptr.vmem [resolvable:$true] %s16_s11 }
   0x3   :  { %s1277_s12 = scalar_lea.vmem %s17_s11, 16  ;;  %p1282_p1 = scmp.lt.s32.totalorder %s17_s11, %s17_s11 }
   0x4   :  { %p1278_p0 = scmp.ne.s32.totalorder %s17_s11, %s1277_s12  ;;  %p1283_p2 = scmp.lt.s32.totalorder %s1277_s12, %s1277_s12 }
   0x6   :  { %p1284_p3 = por %p1283_p2, %p1282_p1 }
   0x8   :  { %p1285_p4 = pnand %p1284_p3, %p1278_p0 }
   0xa   :  { %1288 = shalt.err (!%p1285_p4)
}
   0xb   :  { %s1335_s13 = smov [#allocation2]   ;;  %s1336_s14 = smov [#allocation6]  }
   0xc   :  { %19 = dma.vmem_to_smem %s17_s11, 16, %s1335_s13, [#allocation5]  }
   0xd   :  { %s25_s15 = sshll.u32 %s1336_s14, 4  ;;  %s26_s15 = int_to_ptr.vmem [resolvable:$true] %s25_s15 }
   0xe   :  { %s1297_s16 = scalar_lea.vmem %s26_s15, 2048  ;;  %p1302_p6 = scmp.lt.s32.totalorder %s26_s15, %s26_s15 }
   0xf   :  { %p1298_p5 = scmp.ne.s32.totalorder %s26_s15, %s1297_s16  ;;  %p1303_p7 = scmp.lt.s32.totalorder %s1297_s16, %s1297_s16 }
  0x11   :  { %p1304_p8 = por %p1303_p7, %p1302_p6 }
  0x13   :  { %p1305_p9 = pnand %p1304_p8, %p1298_p5 }
  0x15   :  { %1308 = shalt.err (!%p1305_p9)
}
  0x16   :  { %s1337_s0 = smov 128   ;;  %s1338_s17 = smov 8  }
  0x17   :  { %31 = dma.hbm_to_vmem [thread:$0]  %s1510_s1, 2048, %s26_s15, [#allocation3], %s1337_s0, %s1337_s0, %s1338_s17  }
  0x18   :  { %1329 = dma.done.wait [#allocation5], 16  }
  0x19   :  { %1330 = vsyncadd [#allocation5], 4294967280 }
  0x1a   :  { %1331 = dma.done.wait [#allocation3], 2048  }
  0x1b   :  { %1332 = vsyncadd [#allocation3], 4294965248 }
  0x1c   :  { %38 = sfence }
  0x1d   :  { %s43_s20 = sld [smem:[#allocation2]]  ;;  %vm52_vm0 = vcmask 1040384   ;;  %s1339_s24 = smov 32   ;;  %v1368_v12 = vld [vmem:[#allocation6 + $0x50] sm:$0xff]  ;;  %v1341_v13 = vmov 0.0   ;;  %v1371_v14 = vld [vmem:[#allocation6 + $0x48] sm:$0xff] }
  0x1e   :  { %s1044_s21 = sld [smem:[#allocation2 + $0x1]]  ;;  %s1340_s1 = smov 64   ;;  %1116 = vmatprep.subr.mxu0 %v1341_v13  ;;  %vm1342_vm1 = vmmov 0   ;;  %v1378_v15 = vld [vmem:[#allocation6 + $0x40] sm:$0xff]  ;;  %1127 = vmatprep.subr.mxu1 %v1341_v13  ;;  %v1393_v16 = vld [vmem:[#allocation6 + $0x38] sm:$0xff]  ;;  %vm95_vm2 = vcmask 261120  }
  0x1f   :  { %1124 = vmatprep.mubr.msk.f32.mxu0 %vm1342_vm1, %v1341_v13  ;;  %1117 = vmatpush3.msra.mxu0 %v1368_v12  ;;  %s1047_s25 = sld [smem:[#allocation2 + $0x3]]  ;;  %vm72_vm3 = vcmask 779776   ;;  %vm914_vm4 = vcmask 1041408   ;;  %vm916_vm5 = vcmask 1042432   ;;  %vm918_vm6 = vcmask 1043456  }
  0x20   :  { %1118 = vmatprep.subr.mxu0 %v1341_v13  ;;  %1128 = vmatpush3.msra.mxu1 %v1368_v12  ;;  %s1046_s26 = sld [smem:[#allocation2 + $0x2]]  ;;  %vm920_vm7 = vcmask 1044480   ;;  %vm922_vm8 = vcmask 1045504   ;;  %vm924_vm9 = vcmask 1046528   ;;  %vm1010_vm10 = vcmask 130048  }
  0x21   :  { %1119 = vmatpush3.msra.mxu0 %v1371_v14  ;;  %1129 = vmatprep.subr.mxu1 %v1341_v13  ;;  %s1051_s29 = sld [smem:[#allocation2 + $0x5]] }
  0x22   :  { %1120 = vmatprep.subr.mxu0 %v1341_v13  ;;  %1130 = vmatpush3.msra.mxu1 %v1371_v14  ;;  %s1050_s30 = sld [smem:[#allocation2 + $0x4]] }
  0x23   :  { %s44_s22 = scalar_lea.vmem [#allocation6], %s43_s20  ;;  %1121 = vmatpush3.msra.mxu0 %v1378_v15  ;;  %1131 = vmatprep.subr.mxu1 %v1341_v13  ;;  %s1055_s5 = sld [smem:[#allocation2 + $0x7]] }
  0x24   :  { %v45_v0 = vld [vmem:[%s44_s22] sm:$0x1]  ;;  %s47_s23 = scalar_lea.vmem [#allocation6], %s1044_s21  ;;  %1122 = vmatprep.subr.mxu0 %v1341_v13  ;;  %1132 = vmatpush3.msra.mxu1 %v1378_v15  ;;  %s1054_s6 = sld [smem:[#allocation2 + $0x6]] }
  0x25   :  { %v48_v1 = vld [vmem:[%s47_s23] sm:$0x1]  ;;  %1135 = vmatprep.mubr.msk.f32.mxu1 %vm1342_vm1, %v1341_v13  ;;  %1133 = vmatprep.subr.mxu1 %v1341_v13  ;;  %s86_s27 = scalar_lea.vmem [#allocation6], %s1047_s25  ;;  %s1059_s9 = sld [smem:[#allocation2 + $0x9]] }
  0x26   :  { %v50_v2 = vrot.slane %v48_v1, 7  ;;  %1123 = vmatpush3.msra.mxu0 %v1393_v16  ;;  %1134 = vmatpush3.msra.mxu1 %v1393_v16  ;;  %v87_v20 = vld [vmem:[%s86_s27] sm:$0x1]  ;;  %s83_s28 = scalar_lea.vmem [#allocation6], %s1046_s26  ;;  %s1058_s10 = sld [smem:[#allocation2 + $0x8]] }
  0x27   :  { %1138 = vmatprep.subr.mxu0 %v1341_v13  ;;  %1149 = vmatprep.subr.mxu1 %v1341_v13  ;;  %v89_v21 = vrot.slane %v87_v20, 7  ;;  %v84_v22 = vld [vmem:[%s83_s28] sm:$0x1]  ;;  %s209_s3 = scalar_lea.vmem [#allocation6], %s1051_s29  ;;  %s1063_s13 = sld [smem:[#allocation2 + $0xb]] }
  0x28   :  { %v53_v3 = vsel %vm52_vm0, %v45_v0, %v50_v2  ;;  %v210_v59 = vld [vmem:[%s209_s3] sm:$0x1]  ;;  %s206_s4 = scalar_lea.vmem [#allocation6], %s1050_s30  ;;  %s1062_s14 = sld [smem:[#allocation2 + $0xa]] }
  0x29   :  { %1213 = vtanh.f32 %v53_v3  ;;  %v1045_v5 = vmul.f32 -1.442695, %v53_v3  ;;  %v91_v23 = vsel %vm52_vm0, %v84_v22, %v89_v21  ;;  %v212_v60 = vrot.slane %v210_v59, 7  ;;  %v207_v61 = vld [vmem:[%s206_s4] sm:$0x1]  ;;  %s327_s7 = scalar_lea.vmem [#allocation6], %s1055_s5 }
  0x2a   :  { %s324_s8 = scalar_lea.vmem [#allocation6], %s1054_s6  ;;  %s1067_s0 = sld [smem:[#allocation2 + $0xd]] }
  0x2b   :  { %1215 = vpow2.f32 %v1045_v5  ;;  %v214_v62 = vsel %vm52_vm0, %v207_v61, %v212_v60  ;;  %s445_s11 = scalar_lea.vmem [#allocation6], %s1059_s9  ;;  %s1066_s17 = sld [smem:[#allocation2 + $0xc]] }
  0x2c   :  { %v446_v60 = vld [vmem:[%s445_s11] sm:$0x1]  ;;  %s442_s12 = scalar_lea.vmem [#allocation6], %s1058_s10  ;;  %s1071_s20 = sld [smem:[#allocation2 + $0xf]] }
  0x2d   :  { %v448_v61 = vrot.slane %v446_v60, 7  ;;  %s563_s15 = scalar_lea.vmem [#allocation6], %s1063_s13  ;;  %s1070_s21 = sld [smem:[#allocation2 + $0xe]] }
  0x2e   :  { %s560_s16 = scalar_lea.vmem [#allocation6], %s1062_s14 }
  0x30   :  { %s681_s18 = scalar_lea.vmem [#allocation6], %s1067_s0 }
  0x31   :  { %s678_s19 = scalar_lea.vmem [#allocation6], %s1066_s17 }
  0x32   :  { %s799_s22 = scalar_lea.vmem [#allocation6], %s1071_s20 }
  0x33   :  { %s796_s23 = scalar_lea.vmem [#allocation6], %s1070_s21 }
  0x36   :  { %v1214_v4 = vpop.eup %1213 }
  0x37   :  { %62 = vrot.lane.b32.xlu0 %v1214_v4, %s1339_s24 }
  0x38   :  { %v1216_v6 = vpop.eup %1215 }
  0x39   :  { %v57_v7 = vadd.f32 1.0, %v1216_v6 }
  0x3b   :  { %1217 = vrcp.f32 %v57_v7 }
  0x48   :  { %v1218_v8 = vpop.eup %1217 }
  0xa9   :  { %v63_v9 = vpop.permute.xlu0 %62 }
  0xaa   :  { %v65_v10 = vmul.f32 %v1218_v8, %v63_v9 }
  0xac   :  { %1219 = vtanh.f32 %v65_v10 }
  0xb9   :  { %v1220_v11 = vpop.eup %1219 }
  0xba   :  { %68 = vrot.lane.b32.xlu0 %v1220_v11, %s1340_s1 }
  0xbe   :  { %177 = vrot.lane.b32.xlu0 %v65_v10, %s1339_s24 }
 0x12c   :  { %v69_v17 = vpop.permute.xlu0 %68 }
 0x12d   :  { %v71_v18 = vmul.f32 %v1218_v8, %v69_v17 }
 0x12f   :  { %93 = vrot.lane.b32.xlu1 %v71_v18, %s1340_s1  ;;  %v73_v39 = vsel %vm72_vm3, %v71_v18, 0.0 }
 0x130   :  { %v178_v34 = vpop.permute.xlu0 %177  ;;  %v74_v40 = vrot.slane %v73_v39, 4 }
 0x132   :  { %v75_v41 = vadd.f32 %v74_v40, %v73_v39 }
 0x134   :  { %v76_v42 = vrot.slane %v75_v41, 2 }
 0x136   :  { %v77_v46 = vadd.f32 %v76_v42, %v75_v41 }
 0x138   :  { %v78_v49 = vrot.slane %v77_v46, 1 }
 0x13a   :  { %v79_v52 = vadd.f32 %v78_v49, %v77_v46 }
 0x13c   :  { %v81_v55 = vmul.f32 0.5, %v79_v52 }
 0x1a1   :  { %v94_v19 = vpop.permute.xlu1 %93 }
 0x1a2   :  { %1125 = vmatmul.mubr.msk.f32.vlgmr.msra.gmra.mxu0 %vm95_vm2, %v94_v19 }
 0x1a3   :  { %1139 = vmatpush3.msra.mxu0 %v1368_v12  ;;  %1146 = vmatprep.mubr.msk.f32.mxu0 %vm1342_vm1, %v1341_v13 }
 0x1a4   :  { %1140 = vmatprep.subr.mxu0 %v1341_v13 }
 0x1a5   :  { %1141 = vmatpush3.msra.mxu0 %v1371_v14 }
 0x1a6   :  { %1142 = vmatprep.subr.mxu0 %v1341_v13 }
 0x1a7   :  { %1143 = vmatpush3.msra.mxu0 %v1378_v15 }
 0x1a8   :  { %1144 = vmatprep.subr.mxu0 %v1341_v13 }
 0x1a9   :  { %1145 = vmatpush3.msra.mxu0 %v1393_v16 }
 0x1aa   :  { %1160 = vmatprep.subr.mxu0 %v1341_v13 }
 0x262   :  { %v164_v24 = vpop.f32.mrf.mxu0 }
 0x263   :  { %v168_v25 = vadd.f32 %v164_v24, %v91_v23 }
 0x264   :  { %v1126_v26 = vpop.f32.mrf.mxu0 }
 0x265   :  { %1221 = vtanh.f32 %v168_v25  ;;  %v1049_v28 = vmul.f32 -1.442695, %v168_v25 }
 0x267   :  { %1223 = vpow2.f32 %v1049_v28 }
 0x272   :  { %v1222_v27 = vpop.eup %1221 }
 0x273   :  { %182 = vrot.lane.b32.xlu1 %v1222_v27, %s1339_s24 }
 0x274   :  { %v1224_v29 = vpop.eup %1223 }
 0x275   :  { %v172_v30 = vadd.f32 1.0, %v1224_v29 }
 0x277   :  { %1225 = vrcp.f32 %v172_v30  ;;  %v328_v30 = vld [vmem:[%s327_s7] sm:$0x1] }
 0x284   :  { %v1226_v31 = vpop.eup %1225 }
 0x285   :  { %v180_v35 = vmul.f32 %v1226_v31, %v178_v34 }
 0x2e5   :  { %v183_v32 = vpop.permute.xlu1 %182 }
 0x2e6   :  { %v185_v33 = vmul.f32 %v1226_v31, %v183_v32  ;;  %v325_v32 = vld [vmem:[%s324_s8] sm:$0x1] }
 0x2e8   :  { %187 = vrot.lane.b32.xlu1 %v185_v33, %s1339_s24 }
 0x35a   :  { %v188_v36 = vpop.permute.xlu1 %187 }
 0x35b   :  { %v190_v37 = vadd.f32 %v188_v36, %v180_v35 }
 0x35d   :  { %1227 = vtanh.f32 %v190_v37 }
 0x36a   :  { %v1228_v38 = vpop.eup %1227 }
 0x36b   :  { %193 = vrot.lane.b32.xlu0 %v1228_v38, %s1339_s24 }
 0x3dd   :  { %v194_v43 = vpop.permute.xlu0 %193 }
 0x3de   :  { %v196_v44 = vmul.f32 %v1226_v31, %v194_v43  ;;  %v330_v31 = vrot.slane %v328_v30, 7 }
 0x3e0   :  { %v197_v45 = vsel %vm72_vm3, %v196_v44, 0.0  ;;  %216 = vrot.lane.b32.xlu1 %v196_v44, %s1340_s1  ;;  %v332_v33 = vsel %vm52_vm0, %v325_v32, %v330_v31  ;;  %v564_v31 = vld [vmem:[%s563_s15] sm:$0x1] }
 0x3e1   :  { %v198_v47 = vrot.slane %v197_v45, 4  ;;  %v561_v32 = vld [vmem:[%s560_s16] sm:$0x1] }
 0x3e3   :  { %v199_v48 = vadd.f32 %v198_v47, %v197_v45 }
 0x3e5   :  { %v200_v50 = vrot.slane %v199_v48, 2 }
 0x3e7   :  { %v201_v51 = vadd.f32 %v200_v50, %v199_v48 }
 0x3e9   :  { %v202_v53 = vrot.slane %v201_v51, 1 }
 0x3eb   :  { %v203_v54 = vadd.f32 %v202_v53, %v201_v51 }
 0x3ed   :  { %v204_v56 = vmul.f32 0.5, %v203_v54 }
 0x3ef   :  { %v913_v57 = vsel %vm52_vm0, %v81_v55, %v204_v56 }
 0x452   :  { %v217_v58 = vpop.permute.xlu1 %216 }
 0x453   :  { %1136 = vmatmul.mubr.msk.f32.vlgmr.msra.gmra.mxu1 %vm95_vm2, %v217_v58 }
 0x454   :  { %1150 = vmatpush3.msra.mxu1 %v1368_v12  ;;  %1157 = vmatprep.mubr.msk.f32.mxu1 %vm1342_vm1, %v1341_v13 }
 0x455   :  { %1151 = vmatprep.subr.mxu1 %v1341_v13 }
 0x456   :  { %1152 = vmatpush3.msra.mxu1 %v1371_v14 }
 0x457   :  { %1153 = vmatprep.subr.mxu1 %v1341_v13 }
 0x458   :  { %1154 = vmatpush3.msra.mxu1 %v1378_v15 }
 0x459   :  { %1155 = vmatprep.subr.mxu1 %v1341_v13 }
 0x45a   :  { %1156 = vmatpush3.msra.mxu1 %v1393_v16 }
 0x45b   :  { %1171 = vmatprep.subr.mxu1 %v1341_v13 }
 0x513   :  { %v286_v63 = vpop.f32.mrf.mxu1 }
 0x514   :  { %v290_v0 = vadd.f32 %v286_v63, %v214_v62  ;;  %v443_v62 = vld [vmem:[%s442_s12] sm:$0x1] }
 0x515   :  { %v1137_v1 = vpop.f32.mrf.mxu1  ;;  %v450_v63 = vsel %vm52_vm0, %v443_v62, %v448_v61 }
 0x516   :  { %1229 = vtanh.f32 %v290_v0  ;;  %v1053_v3 = vmul.f32 -1.442695, %v290_v0 }
 0x518   :  { %1231 = vpow2.f32 %v1053_v3 }
 0x523   :  { %v1230_v2 = vpop.eup %1229 }
 0x524   :  { %300 = vrot.lane.b32.xlu0 %v1230_v2, %s1339_s24 }
 0x525   :  { %v1232_v4 = vpop.eup %1231 }
 0x526   :  { %v294_v5 = vadd.f32 1.0, %v1232_v4 }
 0x528   :  { %1233 = vrcp.f32 %v294_v5 }
 0x535   :  { %v1234_v6 = vpop.eup %1233 }
 0x536   :  { %v298_v9 = vmul.f32 %v1234_v6, %v190_v37 }
 0x596   :  { %v301_v7 = vpop.permute.xlu0 %300 }
 0x597   :  { %v303_v8 = vmul.f32 %v1234_v6, %v301_v7 }
 0x599   :  { %305 = vrot.lane.b32.xlu1 %v303_v8, %s1339_s24 }
 0x60b   :  { %v306_v10 = vpop.permute.xlu1 %305 }
 0x60c   :  { %v308_v11 = vadd.f32 %v306_v10, %v298_v9 }
 0x60e   :  { %1235 = vtanh.f32 %v308_v11 }
 0x61b   :  { %v1236_v17 = vpop.eup %1235 }
 0x61c   :  { %311 = vrot.lane.b32.xlu0 %v1236_v17, %s1339_s24 }
 0x68e   :  { %v312_v18 = vpop.permute.xlu0 %311 }
 0x68f   :  { %v314_v19 = vmul.f32 %v1234_v6, %v312_v18 }
 0x691   :  { %v315_v20 = vsel %vm72_vm3, %v314_v19, 0.0  ;;  %334 = vrot.lane.b32.xlu1 %v314_v19, %s1340_s1 }
 0x692   :  { %v316_v21 = vrot.slane %v315_v20, 4 }
 0x694   :  { %v317_v22 = vadd.f32 %v316_v21, %v315_v20 }
 0x696   :  { %v318_v23 = vrot.slane %v317_v22, 2 }
 0x698   :  { %v319_v24 = vadd.f32 %v318_v23, %v317_v22 }
 0x69a   :  { %v320_v25 = vrot.slane %v319_v24, 1 }
 0x69c   :  { %v321_v26 = vadd.f32 %v320_v25, %v319_v24 }
 0x69e   :  { %v322_v27 = vmul.f32 0.5, %v321_v26 }
 0x6a0   :  { %v915_v28 = vsel %vm914_vm4, %v913_v57, %v322_v27 }
 0x703   :  { %v335_v29 = vpop.permute.xlu1 %334 }
 0x704   :  { %1147 = vmatmul.mubr.msk.f32.vlgmr.msra.gmra.mxu0 %vm95_vm2, %v335_v29 }
 0x705   :  { %1161 = vmatpush3.msra.mxu0 %v1368_v12  ;;  %1168 = vmatprep.mubr.msk.f32.mxu0 %vm1342_vm1, %v1341_v13 }
 0x706   :  { %1162 = vmatprep.subr.mxu0 %v1341_v13 }
 0x707   :  { %1163 = vmatpush3.msra.mxu0 %v1371_v14 }
 0x708   :  { %1164 = vmatprep.subr.mxu0 %v1341_v13 }
 0x709   :  { %1165 = vmatpush3.msra.mxu0 %v1378_v15 }
 0x70a   :  { %1166 = vmatprep.subr.mxu0 %v1341_v13 }
 0x70b   :  { %1167 = vmatpush3.msra.mxu0 %v1393_v16 }
 0x70c   :  { %1182 = vmatprep.subr.mxu0 %v1341_v13 }
 0x7c4   :  { %v404_v34 = vpop.f32.mrf.mxu0 }
 0x7c5   :  { %v408_v35 = vadd.f32 %v404_v34, %v332_v33 }
 0x7c6   :  { %v1148_v36 = vpop.f32.mrf.mxu0 }
 0x7c7   :  { %1237 = vtanh.f32 %v408_v35  ;;  %v1057_v38 = vmul.f32 -1.442695, %v408_v35 }
 0x7c9   :  { %1239 = vpow2.f32 %v1057_v38 }
 0x7d4   :  { %v1238_v37 = vpop.eup %1237 }
 0x7d5   :  { %418 = vrot.lane.b32.xlu0 %v1238_v37, %s1339_s24 }
 0x7d6   :  { %v1240_v39 = vpop.eup %1239 }
 0x7d7   :  { %v412_v40 = vadd.f32 1.0, %v1240_v39 }
 0x7d9   :  { %1241 = vrcp.f32 %v412_v40 }
 0x7e6   :  { %v1242_v41 = vpop.eup %1241 }
 0x7e7   :  { %v416_v44 = vmul.f32 %v1242_v41, %v308_v11 }
 0x847   :  { %v419_v42 = vpop.permute.xlu0 %418 }
 0x848   :  { %v421_v43 = vmul.f32 %v1242_v41, %v419_v42 }
 0x84a   :  { %423 = vrot.lane.b32.xlu1 %v421_v43, %s1339_s24 }
 0x8bc   :  { %v424_v45 = vpop.permute.xlu1 %423 }
 0x8bd   :  { %v426_v46 = vadd.f32 %v424_v45, %v416_v44 }
 0x8bf   :  { %1243 = vtanh.f32 %v426_v46 }
 0x8cc   :  { %v1244_v47 = vpop.eup %1243 }
 0x8cd   :  { %429 = vrot.lane.b32.xlu0 %v1244_v47, %s1339_s24 }
 0x93f   :  { %v430_v48 = vpop.permute.xlu0 %429 }
 0x940   :  { %v432_v49 = vmul.f32 %v1242_v41, %v430_v48 }
 0x942   :  { %v433_v50 = vsel %vm72_vm3, %v432_v49, 0.0  ;;  %452 = vrot.lane.b32.xlu1 %v432_v49, %s1340_s1 }
 0x943   :  { %v434_v51 = vrot.slane %v433_v50, 4 }
 0x945   :  { %v435_v52 = vadd.f32 %v434_v51, %v433_v50 }
 0x947   :  { %v436_v53 = vrot.slane %v435_v52, 2 }
 0x949   :  { %v437_v54 = vadd.f32 %v436_v53, %v435_v52 }
 0x94b   :  { %v438_v55 = vrot.slane %v437_v54, 1 }
 0x94d   :  { %v439_v56 = vadd.f32 %v438_v55, %v437_v54 }
 0x94f   :  { %v440_v57 = vmul.f32 0.5, %v439_v56 }
 0x951   :  { %v917_v58 = vsel %vm916_vm5, %v915_v28, %v440_v57  ;;  %v682_v57 = vld [vmem:[%s681_s18] sm:$0x1] }
 0x9b4   :  { %v453_v59 = vpop.permute.xlu1 %452 }
 0x9b5   :  { %1158 = vmatmul.mubr.msk.f32.vlgmr.msra.gmra.mxu1 %vm95_vm2, %v453_v59  ;;  %v679_v59 = vld [vmem:[%s678_s19] sm:$0x1] }
 0x9b6   :  { %1172 = vmatpush3.msra.mxu1 %v1368_v12  ;;  %1179 = vmatprep.mubr.msk.f32.mxu1 %vm1342_vm1, %v1341_v13 }
 0x9b7   :  { %1173 = vmatprep.subr.mxu1 %v1341_v13 }
 0x9b8   :  { %1174 = vmatpush3.msra.mxu1 %v1371_v14 }
 0x9b9   :  { %1175 = vmatprep.subr.mxu1 %v1341_v13 }
 0x9ba   :  { %1176 = vmatpush3.msra.mxu1 %v1378_v15 }
 0x9bb   :  { %1177 = vmatprep.subr.mxu1 %v1341_v13 }
 0x9bc   :  { %1178 = vmatpush3.msra.mxu1 %v1393_v16 }
 0x9bd   :  { %1193 = vmatprep.subr.mxu1 %v1341_v13 }
 0xa75   :  { %v522_v0 = vpop.f32.mrf.mxu1 }
 0xa76   :  { %v526_v1 = vadd.f32 %v522_v0, %v450_v63 }
 0xa77   :  { %v1159_v2 = vpop.f32.mrf.mxu1 }
 0xa78   :  { %1245 = vtanh.f32 %v526_v1  ;;  %v1061_v4 = vmul.f32 -1.442695, %v526_v1 }
 0xa7a   :  { %1247 = vpow2.f32 %v1061_v4 }
 0xa85   :  { %v1246_v3 = vpop.eup %1245 }
 0xa86   :  { %536 = vrot.lane.b32.xlu0 %v1246_v3, %s1339_s24 }
 0xa87   :  { %v1248_v5 = vpop.eup %1247 }
 0xa88   :  { %v530_v6 = vadd.f32 1.0, %v1248_v5 }
 0xa8a   :  { %1249 = vrcp.f32 %v530_v6 }
 0xa97   :  { %v1250_v7 = vpop.eup %1249 }
 0xa98   :  { %v534_v10 = vmul.f32 %v1250_v7, %v426_v46 }
 0xaf8   :  { %v537_v8 = vpop.permute.xlu0 %536 }
 0xaf9   :  { %v539_v9 = vmul.f32 %v1250_v7, %v537_v8 }
 0xafb   :  { %541 = vrot.lane.b32.xlu1 %v539_v9, %s1339_s24 }
 0xb6d   :  { %v542_v11 = vpop.permute.xlu1 %541 }
 0xb6e   :  { %v544_v17 = vadd.f32 %v542_v11, %v534_v10 }
 0xb70   :  { %1251 = vtanh.f32 %v544_v17 }
 0xb7d   :  { %v1252_v18 = vpop.eup %1251 }
 0xb7e   :  { %547 = vrot.lane.b32.xlu0 %v1252_v18, %s1339_s24 }
 0xbf0   :  { %v548_v19 = vpop.permute.xlu0 %547 }
 0xbf1   :  { %v550_v20 = vmul.f32 %v1250_v7, %v548_v19 }
 0xbf3   :  { %v551_v21 = vsel %vm72_vm3, %v550_v20, 0.0  ;;  %570 = vrot.lane.b32.xlu1 %v550_v20, %s1340_s1 }
 0xbf4   :  { %v552_v22 = vrot.slane %v551_v21, 4 }
 0xbf6   :  { %v553_v23 = vadd.f32 %v552_v22, %v551_v21 }
 0xbf8   :  { %v554_v24 = vrot.slane %v553_v23, 2 }
 0xbfa   :  { %v555_v25 = vadd.f32 %v554_v24, %v553_v23 }
 0xbfc   :  { %v556_v26 = vrot.slane %v555_v25, 1 }
 0xbfe   :  { %v557_v27 = vadd.f32 %v556_v26, %v555_v25 }
 0xc00   :  { %v558_v28 = vmul.f32 0.5, %v557_v27 }
 0xc02   :  { %v919_v29 = vsel %vm918_vm6, %v917_v58, %v558_v28  ;;  %v684_v58 = vrot.slane %v682_v57, 7  ;;  %v800_v28 = vld [vmem:[%s799_s22] sm:$0x1] }
 0xc04   :  { %v686_v60 = vsel %vm52_vm0, %v679_v59, %v684_v58 }
 0xc65   :  { %v571_v30 = vpop.permute.xlu1 %570 }
 0xc66   :  { %1169 = vmatmul.mubr.msk.f32.vlgmr.msra.gmra.mxu0 %vm95_vm2, %v571_v30  ;;  %v797_v30 = vld [vmem:[%s796_s23] sm:$0x1] }
 0xc67   :  { %1183 = vmatpush3.msra.mxu0 %v1368_v12  ;;  %1190 = vmatprep.mubr.msk.f32.mxu0 %vm1342_vm1, %v1341_v13  ;;  %v566_v12 = vrot.slane %v564_v31, 7 }
 0xc68   :  { %1184 = vmatprep.subr.mxu0 %v1341_v13 }
 0xc69   :  { %1185 = vmatpush3.msra.mxu0 %v1371_v14  ;;  %v568_v33 = vsel %vm52_vm0, %v561_v32, %v566_v12 }
 0xc6a   :  { %1186 = vmatprep.subr.mxu0 %v1341_v13 }
 0xc6b   :  { %1187 = vmatpush3.msra.mxu0 %v1378_v15 }
 0xc6c   :  { %1188 = vmatprep.subr.mxu0 %v1341_v13 }
 0xc6d   :  { %1189 = vmatpush3.msra.mxu0 %v1393_v16 }
 0xd26   :  { %v640_v34 = vpop.f32.mrf.mxu0 }
 0xd27   :  { %v644_v35 = vadd.f32 %v640_v34, %v568_v33 }
 0xd28   :  { %v1170_v14 = vpop.f32.mrf.mxu0 }
 0xd29   :  { %1253 = vtanh.f32 %v644_v35  ;;  %v1065_v15 = vmul.f32 -1.442695, %v644_v35 }
 0xd2b   :  { %1255 = vpow2.f32 %v1065_v15 }
 0xd36   :  { %v1254_v36 = vpop.eup %1253 }
 0xd37   :  { %654 = vrot.lane.b32.xlu0 %v1254_v36, %s1339_s24 }
 0xd38   :  { %v1256_v37 = vpop.eup %1255 }
 0xd39   :  { %v648_v16 = vadd.f32 1.0, %v1256_v37 }
 0xd3b   :  { %1257 = vrcp.f32 %v648_v16 }
 0xd48   :  { %v1258_v38 = vpop.eup %1257 }
 0xd49   :  { %v652_v41 = vmul.f32 %v1258_v38, %v544_v17 }
 0xda9   :  { %v655_v39 = vpop.permute.xlu0 %654 }
 0xdaa   :  { %v657_v40 = vmul.f32 %v1258_v38, %v655_v39 }
 0xdac   :  { %659 = vrot.lane.b32.xlu1 %v657_v40, %s1339_s24 }
 0xe1e   :  { %v660_v42 = vpop.permute.xlu1 %659 }
 0xe1f   :  { %v662_v43 = vadd.f32 %v660_v42, %v652_v41  ;;  %v929_v42 = vld [vmem:[#allocation6 + $0x70] sm:$0xff] }
 0xe21   :  { %1259 = vtanh.f32 %v662_v43 }
 0xe2e   :  { %v1260_v44 = vpop.eup %1259 }
 0xe2f   :  { %665 = vrot.lane.b32.xlu0 %v1260_v44, %s1339_s24  ;;  %v927_v44 = vld [vmem:[#allocation6 + $0x60] sm:$0xff] }
 0xea1   :  { %v666_v45 = vpop.permute.xlu0 %665 }
 0xea2   :  { %v668_v46 = vmul.f32 %v1258_v38, %v666_v45  ;;  %v926_v45 = vld [vmem:[#allocation6 + $0x58] sm:$0xff] }
 0xea4   :  { %v669_v47 = vsel %vm72_vm3, %v668_v46, 0.0  ;;  %688 = vrot.lane.b32.xlu1 %v668_v46, %s1340_s1 }
 0xea5   :  { %v670_v48 = vrot.slane %v669_v47, 4 }
 0xea7   :  { %v671_v49 = vadd.f32 %v670_v48, %v669_v47 }
 0xea9   :  { %v672_v50 = vrot.slane %v671_v49, 2 }
 0xeab   :  { %v673_v51 = vadd.f32 %v672_v50, %v671_v49 }
 0xead   :  { %v674_v52 = vrot.slane %v673_v51, 1 }
 0xeaf   :  { %v675_v53 = vadd.f32 %v674_v52, %v673_v51 }
 0xeb1   :  { %v676_v54 = vmul.f32 0.5, %v675_v53 }
 0xeb3   :  { %v921_v55 = vsel %vm920_vm7, %v919_v29, %v676_v54  ;;  %v802_v29 = vrot.slane %v800_v28, 7 }
 0xeb5   :  { %v804_v31 = vsel %vm52_vm0, %v797_v30, %v802_v29 }
 0xf16   :  { %v689_v56 = vpop.permute.xlu1 %688 }
 0xf17   :  { %1180 = vmatmul.mubr.msk.f32.vlgmr.msra.gmra.mxu1 %vm95_vm2, %v689_v56 }
 0xf18   :  { %1201 = vmatprep.mubr.msk.f32.mxu1 %vm1342_vm1, %v1341_v13  ;;  %1194 = vmatpush3.msra.mxu1 %v929_v42 }
 0xf19   :  { %1195 = vmatprep.subr.mxu1 %v1341_v13 }
 0xfd7   :  { %v758_v61 = vpop.f32.mrf.mxu1 }
 0xfd8   :  { %v762_v62 = vadd.f32 %v758_v61, %v686_v60 }
 0xfd9   :  { %v1181_v63 = vpop.f32.mrf.mxu1 }
 0xfda   :  { %1261 = vtanh.f32 %v762_v62  ;;  %v1069_v1 = vmul.f32 -1.442695, %v762_v62 }
 0xfdc   :  { %1263 = vpow2.f32 %v1069_v1 }
 0xfe7   :  { %v1262_v0 = vpop.eup %1261 }
 0xfe8   :  { %772 = vrot.lane.b32.xlu0 %v1262_v0, %s1339_s24 }
 0xfe9   :  { %v1264_v2 = vpop.eup %1263 }
 0xfea   :  { %v766_v3 = vadd.f32 1.0, %v1264_v2 }
 0xfec   :  { %1265 = vrcp.f32 %v766_v3 }
 0xff9   :  { %v1266_v4 = vpop.eup %1265 }
 0xffa   :  { %v770_v7 = vmul.f32 %v1266_v4, %v662_v43  ;;  %v928_v43 = vld [vmem:[#allocation6 + $0x68] sm:$0xff] }
 0xffb   :  { %1196 = vmatpush3.msra.mxu1 %v928_v43 }
 0xffc   :  { %1197 = vmatprep.subr.mxu1 %v1341_v13 }
 0xffd   :  { %1198 = vmatpush3.msra.mxu1 %v927_v44 }
 0xffe   :  { %1199 = vmatprep.subr.mxu1 %v1341_v13  ;;  %v1074_v13 = vld [vmem:[#allocation6 + $0x78] ss:$0 sm:$0xff] }
 0xfff   :  { %1200 = vmatpush3.msra.mxu1 %v926_v45 }
0x105a   :  { %v773_v5 = vpop.permute.xlu0 %772 }
0x105b   :  { %v775_v6 = vmul.f32 %v1266_v4, %v773_v5 }
0x105d   :  { %777 = vrot.lane.b32.xlu1 %v775_v6, %s1339_s24 }
0x10cf   :  { %v778_v8 = vpop.permute.xlu1 %777 }
0x10d0   :  { %v780_v9 = vadd.f32 %v778_v8, %v770_v7 }
0x10d2   :  { %1267 = vtanh.f32 %v780_v9 }
0x10df   :  { %v1268_v10 = vpop.eup %1267 }
0x10e0   :  { %783 = vrot.lane.b32.xlu0 %v1268_v10, %s1339_s24 }
0x1152   :  { %v784_v11 = vpop.permute.xlu0 %783 }
0x1153   :  { %v786_v17 = vmul.f32 %v1266_v4, %v784_v11 }
0x1155   :  { %v787_v18 = vsel %vm72_vm3, %v786_v17, 0.0  ;;  %806 = vrot.lane.b32.xlu1 %v786_v17, %s1340_s1 }
0x1156   :  { %v788_v19 = vrot.slane %v787_v18, 4 }
0x1158   :  { %v789_v20 = vadd.f32 %v788_v19, %v787_v18 }
0x115a   :  { %v790_v21 = vrot.slane %v789_v20, 2 }
0x115c   :  { %v791_v22 = vadd.f32 %v790_v21, %v789_v20 }
0x115e   :  { %v792_v23 = vrot.slane %v791_v22, 1 }
0x1160   :  { %v793_v24 = vadd.f32 %v792_v23, %v791_v22 }
0x1162   :  { %v794_v25 = vmul.f32 0.5, %v793_v24 }
0x1164   :  { %v923_v26 = vsel %vm922_vm8, %v921_v55, %v794_v25 }
0x11c7   :  { %v807_v27 = vpop.permute.xlu1 %806 }
0x11c8   :  { %1191 = vmatmul.mubr.msk.f32.vlgmr.msra.gmra.mxu0 %vm95_vm2, %v807_v27 }
0x1288   :  { %v876_v12 = vpop.f32.mrf.mxu0 }
0x1289   :  { %v880_v32 = vadd.f32 %v876_v12, %v804_v31 }
0x128a   :  { %v1192_v33 = vpop.f32.mrf.mxu0 }
0x128b   :  { %1269 = vtanh.f32 %v880_v32  ;;  %v1073_v35 = vmul.f32 -1.442695, %v880_v32 }
0x128d   :  { %1271 = vpow2.f32 %v1073_v35 }
0x1298   :  { %v1270_v34 = vpop.eup %1269 }
0x1299   :  { %890 = vrot.lane.b32.xlu0 %v1270_v34, %s1339_s24 }
0x129a   :  { %v1272_v14 = vpop.eup %1271 }
0x129b   :  { %v884_v36 = vadd.f32 1.0, %v1272_v14 }
0x129d   :  { %1273 = vrcp.f32 %v884_v36 }
0x12aa   :  { %v1274_v15 = vpop.eup %1273 }
0x12ab   :  { %v888_v38 = vmul.f32 %v1274_v15, %v780_v9 }
0x130b   :  { %v891_v37 = vpop.permute.xlu0 %890 }
0x130c   :  { %v893_v16 = vmul.f32 %v1274_v15, %v891_v37 }
0x130e   :  { %895 = vrot.lane.b32.xlu1 %v893_v16, %s1339_s24 }
0x1380   :  { %v896_v39 = vpop.permute.xlu1 %895 }
0x1381   :  { %v898_v40 = vadd.f32 %v896_v39, %v888_v38 }
0x1383   :  { %1275 = vtanh.f32 %v898_v40 }
0x1390   :  { %v1276_v41 = vpop.eup %1275 }
0x1391   :  { %901 = vrot.lane.b32.xlu0 %v1276_v41, %s1339_s24  ;;  %s1343_s24 = smov [#allocation7]  }
0x1392   :  { %s1018_s25 = sshll.u32 %s1343_s24, 4  ;;  %s1019_s25 = int_to_ptr.vmem [resolvable:$true] %s1018_s25 }
0x1393   :  { %s1309_s26 = scalar_lea.vmem %s1019_s25, 128  ;;  %p1314_p11 = scmp.lt.s32.totalorder %s1019_s25, %s1019_s25 }
0x1394   :  { %p1310_p10 = scmp.ne.s32.totalorder %s1019_s25, %s1309_s26  ;;  %p1315_p12 = scmp.lt.s32.totalorder %s1309_s26, %s1309_s26 }
0x1396   :  { %p1316_p13 = por %p1315_p12, %p1314_p11 }
0x1398   :  { %p1317_p0 = pnand %p1316_p13, %p1310_p10 }
0x1403   :  { %v902_v46 = vpop.permute.xlu0 %901 }
0x1404   :  { %v904_v47 = vmul.f32 %v1274_v15, %v902_v46 }
0x1406   :  { %v905_v48 = vsel %vm72_vm3, %v904_v47, 0.0 }
0x1407   :  { %v906_v49 = vrot.slane %v905_v48, 4 }
0x1409   :  { %v907_v50 = vadd.f32 %v906_v49, %v905_v48 }
0x140b   :  { %v908_v51 = vrot.slane %v907_v50, 2 }
0x140d   :  { %v909_v52 = vadd.f32 %v908_v51, %v907_v50 }
0x140f   :  { %v910_v53 = vrot.slane %v909_v52, 1 }
0x1411   :  { %v911_v54 = vadd.f32 %v910_v53, %v909_v52 }
0x1413   :  { %v912_v55 = vmul.f32 0.5, %v911_v54 }
0x1415   :  { %v925_v56 = vsel %vm924_vm9, %v923_v26, %v912_v55 }
0x1416   :  { %936 = vrot.lane.b32.xlu1 %v925_v56, %s1340_s1 }
0x1488   :  { %v937_v57 = vpop.permute.xlu1 %936 }
0x1489   :  { %1202 = vmatmul.mubr.msk.f32.vlgmr.msra.gmra.mxu1 %vm95_vm2, %v937_v57 }
0x1549   :  { %v1006_v58 = vpop.f32.mrf.mxu1 }
0x154a   :  { %v1007_v59 = vadd.f32 %v1074_v13, %v1006_v58 }
0x154b   :  { %v1203_v60 = vpop.f32.mrf.mxu1 }
0x154c   :  { %1011 = vst.msk [vmem:[#allocation7] sm:$0xff] %vm1010_vm10, %v1007_v59 }
0x154d   :  { %1320 = shalt.err (!%p1317_p0)
}
0x154e   :  { %1021 = dma.vmem_to_hbm [thread:$0]  %s1019_s25, 128, %s1511_s2, [#allocation4]  }
0x154f   :  { %1333 = dma.done.wait [#allocation4], 128  }
0x1550   :  { %1334 = vsyncadd [#allocation4], 4294967168 }
0x1551   :  { %1025 = vsyncpa [#allocation3], 1 }
0x1552   :  { %1026 = vsyncpa [#allocation4], 1 }
0x1553   :  { %1027 = vsyncpa [#allocation5], 1 }

</bundles_post_ra>
